<compile_context>
chip_gen: v5e
topology: v5e:2x2
jax: 0.10.0
libtpu: 0.0.40
codegen_flags: <defaults>
</compile_context>

<pallas_src>
import functools
import math

import jax
import jax.numpy as jnp
from jax import lax
from jax.experimental import pallas as pl
from jax.experimental.pallas import tpu as pltpu

_NEG_FILL = -1e30  # finite "minus infinity": exp(-1e30 - m) underflows to 0, no NaNs


def _online_softmax_step(q, k, v, mask, m_sc, l_sc, acc_sc, scale):
    """One (q-tile, kv-tile) step of online-softmax attention."""
    # Fold the softmax scale into Q (cheaper than scaling the (tq, tk) scores).
    q_scaled = q * scale  # python-float scale keeps the input dtype (bf16 stays bf16)

    # QK^T contracting on D without an explicit transpose (MXU-friendly layout).
    s = lax.dot_general(
        q_scaled, k,
        dimension_numbers=(((1,), (1,)), ((), ())),
        preferred_element_type=jnp.float32,
    )  # (tq, tk) f32

    if mask is not None:
        s = jnp.where(mask == 0, _NEG_FILL, s)

    m_prev = m_sc[...]                                           # (tq, 1)
    m_new = jnp.maximum(m_prev, jnp.max(s, axis=-1, keepdims=True))
    alpha = jnp.exp(m_prev - m_new)                              # (tq, 1)
    p = jnp.exp(s - m_new)                                       # (tq, tk) f32

    l_sc[...] = alpha * l_sc[...] + jnp.sum(p, axis=-1, keepdims=True)
    pv = jnp.dot(p.astype(v.dtype), v, preferred_element_type=jnp.float32)  # (tq, D)
    acc_sc[...] = alpha * acc_sc[...] + pv
    m_sc[...] = m_new


def _init_scratch(m_sc, l_sc, acc_sc):
    m_sc[...] = jnp.full_like(m_sc, -jnp.inf)
    l_sc[...] = jnp.zeros_like(l_sc)
    acc_sc[...] = jnp.zeros_like(acc_sc)


def _finalize(o_ref, m_sc, l_sc, acc_sc):
    # Normalization deferred to here: one exact reciprocal per output tile,
    # off the hot kv loop. Guard against an (impossible in practice) zero denom.
    inv = pl.reciprocal(jnp.maximum(l_sc[...], 1e-30), approx=False)
    o_ref[0] = (acc_sc[...] * inv).astype(o_ref.dtype)


def _attn_kernel(q_ref, k_ref, v_ref, o_ref, m_sc, l_sc, acc_sc, *, scale):
    ki = pl.program_id(2)

    @pl.when(ki == 0)
    def _():
        _init_scratch(m_sc, l_sc, acc_sc)

    _online_softmax_step(q_ref[0], k_ref[0], v_ref[0], None, m_sc, l_sc, acc_sc, scale)

    @pl.when(ki == pl.num_programs(2) - 1)
    def _():
        _finalize(o_ref, m_sc, l_sc, acc_sc)


def _attn_kernel_masked(q_ref, k_ref, v_ref, mask_ref, o_ref, m_sc, l_sc, acc_sc, *, scale):
    ki = pl.program_id(2)

    @pl.when(ki == 0)
    def _():
        _init_scratch(m_sc, l_sc, acc_sc)

    _online_softmax_step(q_ref[0], k_ref[0], v_ref[0], mask_ref[0],
                         m_sc, l_sc, acc_sc, scale)

    @pl.when(ki == pl.num_programs(2) - 1)
    def _():
        _finalize(o_ref, m_sc, l_sc, acc_sc)


def _pick_block(dim, candidates=(256, 128)):
    """Largest candidate tile that divides `dim`, else the full dim (small-shape path)."""
    for c in candidates:
        if dim % c == 0:
            return c
    return dim


def attention_compute(query, key, value, mask=None, scale=None, dropout=0.0,
                      block_q=None, block_k=None):
    """Pallas flash-attention equivalent of AttentionCompute.forward for [B, S, D] inputs."""
    B, S, D = query.shape
    if scale is None:
        scale = float(1.0 / math.sqrt(D))
    # TODO(synk): training-mode dropout on attention probs not implemented (module default p=0.0).

    tq = block_q if block_q is not None else _pick_block(S)
    tk = block_k if block_k is not None else _pick_block(S)
    assert S % tq == 0 and S % tk == 0, "block sizes must divide seq_len"

    grid = (B, S // tq, S // tk)

    qo_spec = pl.BlockSpec((1, tq, D), lambda b, qi, ki: (b, qi, 0))
    kv_spec = pl.BlockSpec((1, tk, D), lambda b, qi, ki: (b, ki, 0))
    out_shape = jax.ShapeDtypeStruct((B, S, D), query.dtype)
    scratch_shapes = [
        pltpu.VMEM((tq, 1), jnp.float32),   # running max m
        pltpu.VMEM((tq, 1), jnp.float32),   # running denom l
        pltpu.VMEM((tq, D), jnp.float32),   # unnormalized output accumulator
    ]
    cp = pltpu.CompilerParams(
        dimension_semantics=("parallel", "parallel", "arbitrary"))

    if mask is None:
        return pl.pallas_call(
            functools.partial(_attn_kernel, scale=scale),
            out_shape=out_shape,
            grid=grid,
            in_specs=[qo_spec, kv_spec, kv_spec],
            out_specs=qo_spec,
            scratch_shapes=scratch_shapes,
            compiler_params=cp,
        )(query, key, value)
    else:
        mask_spec = pl.BlockSpec((1, tq, tk), lambda b, qi, ki: (b, qi, ki))
        return pl.pallas_call(
            functools.partial(_attn_kernel_masked, scale=scale),
            out_shape=out_shape,
            grid=grid,
            in_specs=[qo_spec, kv_spec, kv_spec, mask_spec],
            out_specs=qo_spec,
            scratch_shapes=scratch_shapes,
            compiler_params=cp,
        )(query, key, value, mask.astype(jnp.int8))


def _reference(query, key, value, mask=None, scale=None):
    B, S, D = query.shape
    if scale is None:
        scale = 1.0 / math.sqrt(D)
    s = jnp.einsum("bqd,bkd->bqk", query, key) * scale
    if mask is not None:
        s = jnp.where(mask == 0, -jnp.inf, s)
    p = jax.nn.softmax(s, axis=-1)
    return jnp.einsum("bqk,bkd->bqd", p, value)


if __name__ == "__main__":
    # --- Small shapes consistent with the module's 3-D forward path ---
    key0 = jax.random.PRNGKey(0)
    kq, kk, kv = jax.random.split(key0, 3)
    B, S, D = 2, 8, 32
    q = jax.random.normal(kq, (B, S, D), dtype=jnp.float32)
    k = jax.random.normal(kk, (B, S, D), dtype=jnp.float32)
    v = jax.random.normal(kv, (B, S, D), dtype=jnp.float32)

    out = jax.block_until_ready(attention_compute(q, k, v))
    ref = _reference(q, k, v)
    assert out.shape == (B, S, D)
    assert jnp.allclose(out, ref, atol=1e-4, rtol=1e-4), "unmasked mismatch vs reference"

    causal = jnp.tril(jnp.ones((S, S), dtype=jnp.int32))[None].repeat(B, axis=0)
    out_m = jax.block_until_ready(attention_compute(q, k, v, mask=causal))
    ref_m = _reference(q, k, v, mask=causal)
    assert jnp.allclose(out_m, ref_m, atol=1e-4, rtol=1e-4), "masked mismatch vs reference"

    # --- Exercise the tiled flash path (multiple kv blocks, init/finalize, mask tiles) ---
    B2, S2, D2 = 2, 256, 32
    kq2, kk2, kv2 = jax.random.split(jax.random.PRNGKey(1), 3)
    q2 = jax.random.normal(kq2, (B2, S2, D2), dtype=jnp.float32)
    k2 = jax.random.normal(kk2, (B2, S2, D2), dtype=jnp.float32)
    v2 = jax.random.normal(kv2, (B2, S2, D2), dtype=jnp.float32)

    out2 = jax.block_until_ready(
        attention_compute(q2, k2, v2, block_q=128, block_k=128))
    ref2 = _reference(q2, k2, v2)
    assert jnp.allclose(out2, ref2, atol=1e-4, rtol=1e-4), "tiled mismatch vs reference"

    causal2 = jnp.tril(jnp.ones((S2, S2), dtype=jnp.int32))[None].repeat(B2, axis=0)
    out2m = jax.block_until_ready(
        attention_compute(q2, k2, v2, mask=causal2, block_q=128, block_k=128))
    ref2m = _reference(q2, k2, v2, mask=causal2)
    assert jnp.allclose(out2m, ref2m, atol=1e-4, rtol=1e-4), "tiled masked mismatch vs reference"

    print("KERNEL_OK")
</pallas_src>

<mosaic_0001>
module attributes {stable_mosaic.version = 11 : i64} {
  func.func @_attn_kernel(%arg0: i32, %arg1: i32, %arg2: i32, %arg3: memref<1x8x32xf32, #tpu.memory_space<vmem>>, %arg4: memref<1x8x32xf32, #tpu.memory_space<vmem>>, %arg5: memref<1x8x32xf32, #tpu.memory_space<vmem>>, %arg6: memref<1x8x32xf32, #tpu.memory_space<vmem>>, %arg7: memref<8x1xf32, #tpu.memory_space<vmem>>, %arg8: memref<8x1xf32, #tpu.memory_space<vmem>>, %arg9: memref<8x32xf32, #tpu.memory_space<vmem>>) attributes {dimension_semantics = [#tpu.dimension_semantics<parallel>, #tpu.dimension_semantics<parallel>, #tpu.dimension_semantics<arbitrary>], iteration_bounds = array<i64: 2, 1, 1>, scalar_prefetch = 0 : i64, scratch_operands = 3 : i64, tpu.core_type = #tpu.core_type<tc>, window_params = [{transform_indices = @transform_0, window_bounds = array<i64: 1, 8, 32>}, {transform_indices = @transform_1, window_bounds = array<i64: 1, 8, 32>}, {transform_indices = @transform_2, window_bounds = array<i64: 1, 8, 32>}, {transform_indices = @transform_3, window_bounds = array<i64: 1, 8, 32>}]} {
    %c0_i32 = arith.constant 0 : i32
    %0 = arith.cmpi eq, %arg2, %c0_i32 : i32
    %1 = arith.extui %0 : i1 to i32
    %c0_i32_0 = arith.constant 0 : i32
    %2 = arith.cmpi ne, %1, %c0_i32_0 : i32
    scf.if %2 {
      %cst_27 = arith.constant 0xFF800000 : f32
      %37 = vector.broadcast %cst_27 : f32 to vector<8x1xf32>
      %c0_28 = arith.constant 0 : index
      %c0_29 = arith.constant 0 : index
      %38 = vector.load %arg7[%c0_28, %c0_29] : memref<8x1xf32, #tpu.memory_space<vmem>>, vector<8x1xf32>
      tpu.vector_store %arg7[%c0_28, %c0_29], %37 {strides = array<i32>} : memref<8x1xf32, #tpu.memory_space<vmem>>, vector<8x1xf32>,
      %cst_30 = arith.constant 0.000000e+00 : f32
      %39 = vector.broadcast %cst_30 : f32 to vector<8x1xf32>
      %c0_31 = arith.constant 0 : index
      %c0_32 = arith.constant 0 : index
      %40 = vector.load %arg8[%c0_31, %c0_32] : memref<8x1xf32, #tpu.memory_space<vmem>>, vector<8x1xf32>
      tpu.vector_store %arg8[%c0_31, %c0_32], %39 {strides = array<i32>} : memref<8x1xf32, #tpu.memory_space<vmem>>, vector<8x1xf32>,
      %cst_33 = arith.constant 0.000000e+00 : f32
      %41 = vector.broadcast %cst_33 : f32 to vector<8x32xf32>
      %c0_34 = arith.constant 0 : index
      %c0_35 = arith.constant 0 : index
      %42 = vector.load %arg9[%c0_34, %c0_35] : memref<8x32xf32, #tpu.memory_space<vmem>>, vector<8x32xf32>
      tpu.vector_store %arg9[%c0_34, %c0_35], %41 {strides = array<i32>} : memref<8x32xf32, #tpu.memory_space<vmem>>, vector<8x32xf32>,
    } else {
    }
    %c0 = arith.constant 0 : index
    %c0_1 = arith.constant 0 : index
    %c0_2 = arith.constant 0 : index
    %3 = vector.load %arg3[%c0, %c0_1, %c0_2] : memref<1x8x32xf32, #tpu.memory_space<vmem>>, vector<1x8x32xf32>
    %4 = vector.shape_cast %3 : vector<1x8x32xf32> to vector<8x32xf32>
    %c0_3 = arith.constant 0 : index
    %c0_4 = arith.constant 0 : index
    %c0_5 = arith.constant 0 : index
    %5 = vector.load %arg4[%c0_3, %c0_4, %c0_5] : memref<1x8x32xf32, #tpu.memory_space<vmem>>, vector<1x8x32xf32>
    %6 = vector.shape_cast %5 : vector<1x8x32xf32> to vector<8x32xf32>
    %c0_6 = arith.constant 0 : index
    %c0_7 = arith.constant 0 : index
    %c0_8 = arith.constant 0 : index
    %7 = vector.load %arg5[%c0_6, %c0_7, %c0_8] : memref<1x8x32xf32, #tpu.memory_space<vmem>>, vector<1x8x32xf32>
    %8 = vector.shape_cast %7 : vector<1x8x32xf32> to vector<8x32xf32>
    %cst = arith.constant 0.176776692 : f32
    %9 = vector.broadcast %cst : f32 to vector<8x32xf32>
    %10 = arith.mulf %4, %9 : vector<8x32xf32>
    %cst_9 = arith.constant dense<0.000000e+00> : vector<8x8xf32>
    %11 = tpu.matmul %10, %6, %cst_9 {dimension_numbers = #tpu.dot_dimension_numbers<[1], [1], [0], [0], [0, 0, 1, 0], [], []>} : vector<8x32xf32>, vector<8x32xf32>, vector<8x8xf32> -> vector<8x8xf32>
    %c0_10 = arith.constant 0 : index
    %c0_11 = arith.constant 0 : index
    %12 = vector.load %arg7[%c0_10, %c0_11] : memref<8x1xf32, #tpu.memory_space<vmem>>, vector<8x1xf32>
    %cst_12 = arith.constant dense<0xFF800000> : vector<8xf32>
    %13 = vector.multi_reduction <maximumf>, %11, %cst_12 [1] : vector<8x8xf32> to vector<8xf32>
    %14 = vector.shape_cast %13 : vector<8xf32> to vector<8x1xf32>
    %15 = arith.maximumf %12, %14 : vector<8x1xf32>
    %16 = arith.subf %12, %15 : vector<8x1xf32>
    %17 = math.exp %16 : vector<8x1xf32>
    %18 = vector.broadcast %15 : vector<8x1xf32> to vector<8x8xf32>
    %19 = arith.subf %11, %18 : vector<8x8xf32>
    %20 = math.exp %19 : vector<8x8xf32>
    %c0_13 = arith.constant 0 : index
    %c0_14 = arith.constant 0 : index
    %21 = vector.load %arg8[%c0_13, %c0_14] : memref<8x1xf32, #tpu.memory_space<vmem>>, vector<8x1xf32>
    %22 = arith.mulf %17, %21 : vector<8x1xf32>
    %cst_15 = arith.constant dense<0.000000e+00> : vector<8xf32>
    %23 = vector.multi_reduction <add>, %20, %cst_15 [1] : vector<8x8xf32> to vector<8xf32>
    %24 = vector.shape_cast %23 : vector<8xf32> to vector<8x1xf32>
    %25 = arith.addf %22, %24 : vector<8x1xf32>
    %c0_16 = arith.constant 0 : index
    %c0_17 = arith.constant 0 : index
    %26 = vector.load %arg8[%c0_16, %c0_17] : memref<8x1xf32, #tpu.memory_space<vmem>>, vector<8x1xf32>
    tpu.vector_store %arg8[%c0_16, %c0_17], %25 {strides = array<i32>} : memref<8x1xf32, #tpu.memory_space<vmem>>, vector<8x1xf32>,
    %cst_18 = arith.constant dense<0.000000e+00> : vector<8x32xf32>
    %27 = tpu.matmul %20, %8, %cst_18 {dimension_numbers = #tpu.dot_dimension_numbers<[1], [0], [0], [1], [0, 0, 1, 1], [], []>} : vector<8x8xf32>, vector<8x32xf32>, vector<8x32xf32> -> vector<8x32xf32>
    %c0_19 = arith.constant 0 : index
    %c0_20 = arith.constant 0 : index
    %28 = vector.load %arg9[%c0_19, %c0_20] : memref<8x32xf32, #tpu.memory_space<vmem>>, vector<8x32xf32>
    %29 = vector.broadcast %17 : vector<8x1xf32> to vector<8x32xf32>
    %30 = arith.mulf %29, %28 : vector<8x32xf32>
    %31 = arith.addf %30, %27 : vector<8x32xf32>
    %c0_21 = arith.constant 0 : index
    %c0_22 = arith.constant 0 : index
    %32 = vector.load %arg9[%c0_21, %c0_22] : memref<8x32xf32, #tpu.memory_space<vmem>>, vector<8x32xf32>
    tpu.vector_store %arg9[%c0_21, %c0_22], %31 {strides = array<i32>} : memref<8x32xf32, #tpu.memory_space<vmem>>, vector<8x32xf32>,
    %c0_23 = arith.constant 0 : index
    %c0_24 = arith.constant 0 : index
    %33 = vector.load %arg7[%c0_23, %c0_24] : memref<8x1xf32, #tpu.memory_space<vmem>>, vector<8x1xf32>
    tpu.vector_store %arg7[%c0_23, %c0_24], %15 {strides = array<i32>} : memref<8x1xf32, #tpu.memory_space<vmem>>, vector<8x1xf32>,
    %c0_i32_25 = arith.constant 0 : i32
    %34 = arith.cmpi eq, %arg2, %c0_i32_25 : i32
    %35 = arith.extui %34 : i1 to i32
    %c0_i32_26 = arith.constant 0 : i32
    %36 = arith.cmpi ne, %35, %c0_i32_26 : i32
    scf.if %36 {
      %c0_27 = arith.constant 0 : index
      %c0_28 = arith.constant 0 : index
      %37 = vector.load %arg8[%c0_27, %c0_28] : memref<8x1xf32, #tpu.memory_space<vmem>>, vector<8x1xf32>
      %cst_29 = arith.constant 1.000000e-30 : f32
      %38 = vector.broadcast %cst_29 : f32 to vector<8x1xf32>
      %39 = arith.maximumf %37, %38 : vector<8x1xf32>
      %40 = tpu.reciprocal %39 : vector<8x1xf32> -> vector<8x1xf32>
      %c0_30 = arith.constant 0 : index
      %c0_31 = arith.constant 0 : index
      %41 = vector.load %arg9[%c0_30, %c0_31] : memref<8x32xf32, #tpu.memory_space<vmem>>, vector<8x32xf32>
      %42 = vector.broadcast %40 : vector<8x1xf32> to vector<8x32xf32>
      %43 = arith.mulf %41, %42 : vector<8x32xf32>
      %c0_32 = arith.constant 0 : index
      %c0_33 = arith.constant 0 : index
      %c0_34 = arith.constant 0 : index
      %44 = vector.load %arg6[%c0_32, %c0_33, %c0_34] : memref<1x8x32xf32, #tpu.memory_space<vmem>>, vector<1x8x32xf32>
      %45 = vector.shape_cast %44 : vector<1x8x32xf32> to vector<8x32xf32>
      %46 = vector.shape_cast %43 : vector<8x32xf32> to vector<1x8x32xf32>
      tpu.vector_store %arg6[%c0_32, %c0_33, %c0_34], %46 {strides = array<i32>} : memref<1x8x32xf32, #tpu.memory_space<vmem>>, vector<1x8x32xf32>,
    } else {
    }
    return
  }
  func.func @transform_0(%arg0: i32, %arg1: i32, %arg2: i32) -> (i32, i32, i32) {
    %c0_i32 = arith.constant 0 : i32
    %c0_i32_0 = arith.constant 0 : i32
    return %arg0, %arg1, %c0_i32 : i32, i32, i32
  }
  func.func @transform_1(%arg0: i32, %arg1: i32, %arg2: i32) -> (i32, i32, i32) {
    %c0_i32 = arith.constant 0 : i32
    %c0_i32_0 = arith.constant 0 : i32
    return %arg0, %arg2, %c0_i32 : i32, i32, i32
  }
  func.func @transform_2(%arg0: i32, %arg1: i32, %arg2: i32) -> (i32, i32, i32) {
    %c0_i32 = arith.constant 0 : i32
    %c0_i32_0 = arith.constant 0 : i32
    return %arg0, %arg2, %c0_i32 : i32, i32, i32
  }
  func.func @transform_3(%arg0: i32, %arg1: i32, %arg2: i32) -> (i32, i32, i32) {
    %c0_i32 = arith.constant 0 : i32
    %c0_i32_0 = arith.constant 0 : i32
    return %arg0, %arg1, %c0_i32 : i32, i32, i32
  }
}

</mosaic_0001>

<bundles_post_ra>
// kernel: tpu_custom_call.1
= control target key start
LH: loop header
LB: loop body
LE: loop exit
PB: predicated region body
PF: predicated region fallthrough
CT: control target
= control target key end

     0   :  { %s1040_s0 = inlined_call_operand.hbm [shape: f32[2,8,32], index: 0, kind: input, shape index: {}]   ;;  %s1041_s1 = inlined_call_operand.hbm [shape: f32[2,8,32], index: 1, kind: input, shape index: {}]   ;;  %s1042_s2 = inlined_call_operand.hbm [shape: f32[2,8,32], index: 2, kind: input, shape index: {}]   ;;  %s1043_s3 = inlined_call_operand.hbm [shape: f32[2,8,32], index: 3, kind: output, shape index: {}]  }
   0x1   :  { %1046 = sst [smem:[#allocation18_spill]] %s1041_s1 }
   0x2   :  { %8 = vsyncpa [#allocation6], 0 }
   0x3   :  { %10 = vsyncpa [#allocation6 + $0x1], 0 }
   0x4   :  { %11 = vsyncpa [#allocation9], 0 }
   0x5   :  { %13 = vsyncpa [#allocation9 + $0x1], 0 }
   0x6   :  { %14 = vsyncpa [#allocation7], 0 }
   0x7   :  { %16 = vsyncpa [#allocation7 + $0x1], 0  ;;  %s870_s12 = smov 0   ;;  %s872_s13 = smov 0  }
   0x8   :  { %s874_s14 = smov 0   ;;  %s876_s15 = smov 0  }
   0x9   :  { %s878_s16 = smov 0   ;;  %s880_s17 = smov 0  }
   0xa LB: > { %1047 = sst [smem:[#allocation15_spill]] %s841_s16  ;;  %s901_s18 = sadd.s32 4294967295, %s845_s17   ;;  %s845_s17 = sphi %s880_s17, %s22_s17   ;;  %s841_s16 = sphi %s878_s16, %s1059_s16   ;;  %s837_s15 = sphi %s876_s15, %s1058_s15   ;;  %s833_s14 = sphi %s874_s14, %s1062_s14   ;;  %s829_s13 = sphi %s872_s13, %s1061_s13   ;;  %s825_s12 = sphi %s870_s12, %s1060_s12  }
   0xb   : > { %s564_s19 = sadd.s32 4294967294, %s845_s17   ;;  %s41_s20 = sadd.s32 1, %s841_s16 }
   0xc   : > { %s50_s21 = sadd.s32 1, %s833_s14  ;;  %p43_p0 = scmp.ge.s32.totalorder %s41_s20, 2 }
   0xd   : > { %p57_p1 = scmp.ne.s32.totalorder %s833_s14, %s829_s13  ;;  %p58_p2 = scmp.eq.s32.totalorder %s845_s17, 0 }
   0xe   : > { %p63_p3 = scmp.ne.s32.totalorder %s829_s13, %s825_s12  ;;  %s1064_s20 = smov (%p43_p0, %s41_s20), 0 }
   0xf   : > { %1048 = sst [smem:[#allocation16_spill]] %s1064_s20  ;;  %p913_p4 = por %p58_p2, %p57_p1 }
  0x10   : > { %p64_p5 = scmp.eq.s32.totalorder %s901_s18, 0  ;;  %s45_s23 = ssub.s32 %s841_s16, %s1064_s20 }
  0x11   : > { %p145_p6 = scmp.eq.s32.totalorder %s901_s18, 1  ;;  %p48_p7 = scmp.eq.s32.totalorder %s45_s23, 0 }
  0x12   : > { %p921_p8 = por %p64_p5, %p63_p3  ;;  %p151_p10 = scmp.eq.s32.totalorder %s564_s19, 1 }
  0x13   : > { %p925_p9 = por %p145_p6, %p57_p1  ;;  %p566_p12 = scmp.ge.s32.totalorder %s845_s17, 2 }
  0x14   : > { %s930_s26 = scalar_select %p48_p7, %s833_s14, %s50_s21  }
  0x15   : > { %p932_p11 = por %p151_p10, %p63_p3  ;;  %p607_p13 = scmp.lt.s32.totalorder %s845_s17, 2 }
  0x16   : > { %1052 = sst [smem:[#allocation17_spill]] %s930_s26  ;;  %s171_s28 = sand.u32 1, %s833_s14  }
  0x17   : > { %s567_s29 = sshll.u32 %s171_s28, 3  ;;  %s568_s30 = sshll.u32 %s841_s16, 3 }
  0x18   : > { %p942_p0 = pnand %p607_p13, %p913_p4  ;;  %s191_s5 = sand.u32 1, %s845_s17  }
  0x19   : > { %s1055_s1 = sld [smem:[#allocation18_spill]]  ;;  %s195_s10 = scalar_lea.vmem [#allocation8], %s567_s29 }
  0x1a   : > { %s204_s11 = sshll.u32 %s195_s10, 4  ;;  %s192_s19 = scalar_lea.sflag [#allocation9], %s191_s5  ;;  %s205_s11 = int_to_ptr.vmem [resolvable:$true] %s204_s11 }
  0x1b   : > { %p573_p1 = scmp.ge.s32.totalorder %s845_s17, 1  ;;  %p229_p2 = scmp.lt.s32.totalorder %s845_s17, 3 }
  0x1c   : > { %s180_s6 = scalar_lea.hbm %s1040_s0, %s568_s30  ;;  %s172_s10 = scalar_lea.sflag [#allocation6], %s171_s28 }
  0x1d   : > { %p954_p3 = pnand %p573_p1, %p229_p2  ;;  %s182_s7 = sshll.u32 %s180_s6, 4  ;;  %s183_s7 = int_to_ptr.hbm [resolvable:$true] %s182_s7 }
  0x1e   : > { %s215_s16 = scalar_lea.vmem [#allocation10], %s567_s29  ;;  %s971_s22 = sand.u32 (!%p954_p3), 1, %s829_s13  }
  0x1f   : > { %s200_s8 = scalar_lea.hbm %s1055_s1, %s568_s30  ;;  %s224_s26 = sshll.u32 %s215_s16, 4  ;;  %s225_s26 = int_to_ptr.vmem [resolvable:$true] %s224_s26 }
  0x20   : > { %s202_s9 = sshll.u32 %s200_s8, 4  ;;  %s175_s8 = scalar_lea.vmem [#allocation5], %s567_s29  ;;  %s203_s9 = int_to_ptr.hbm [resolvable:$true] %s202_s9 }
  0x21   : > { %599 = dma.hbm_to_vmem [thread:$0]  (!%p942_p0), %s203_s9, 128, %s205_s11, %s192_s19  }
  0x22   : > { %s184_s1 = sshll.u32 %s175_s8, 4  ;;  %s220_s11 = scalar_lea.hbm %s1042_s2, %s568_s30  ;;  %s185_s1 = int_to_ptr.vmem [resolvable:$true] %s184_s1 }
  0x23   : > { %596 = dma.hbm_to_vmem [thread:$0]  (!%p942_p0), %s183_s7, 128, %s185_s1, %s172_s10  }
  0x24   : > { %s222_s20 = sshll.u32 %s220_s11, 4  ;;  %233 = sbr.rel (%p954_p3) target bundleno = 662 (0x296), region = 32  ;;  %s223_s20 = int_to_ptr.hbm [resolvable:$true] %s222_s20 }
  0x25   : > { %602 = dma.hbm_to_vmem [thread:$0]  (!%p942_p0), %s223_s20, 128, %s225_s26, %s192_s19  }
  0x26   : > { %s974_s1 = sshll.u32 (!%p954_p3), %s971_s22, 3  ;;  %s236_s28 = scalar_lea.sflag (!%p954_p3), [#allocation6], %s971_s22 }
  0x27   : > { %s239_s30 = scalar_lea.vmem (!%p954_p3), [#allocation5], %s974_s1 }
  0x29   : > { %812 = dma.done.wait (%p921_p8), %s236_s28, 128  }
  0x2a   : > { %814 = vsyncadd (%p921_p8), %s236_s28, 4294967168  ;;  %s245_s16 = sand.u32 1, %s901_s18   ;;  %s249_s26 = scalar_lea.vmem [#allocation8], %s974_s1 }
  0x2b   : > { %s246_s20 = scalar_lea.sflag [#allocation9], %s245_s16 }
  0x2c   : > { %816 = dma.done.wait (%p921_p8), %s246_s20, 256  }
  0x2d   : > { %818 = vsyncadd (%p921_p8), %s246_s20, 4294967040  ;;  %vm300_vm0 = vcmask 261120   ;;  %v847_v0 = vmov 0.0   ;;  %v303_v1 = vld [vmem:[%s249_s26] sm:$0xff]  ;;  %v302_v2 = vld [vmem:[%s239_s30] sm:$0xff]  ;;  %vm297_vm1 = vcmask 7168  }
  0x2e   : > { %301 = vst.msk [vmem:[#allocation4] sm:$0xff] %vm300_vm0, %v847_v0  ;;  %578 = vmatpush.xpose.msk.msra.mxu0 %vm300_vm0, %v303_v1  ;;  %v305_v3 = vmul.f32 0.17677669, %v302_v2  ;;  %v848_v4 = vmov -inf   ;;  %vm334_vm2 = vcmask 64512   ;;  %v849_v7 = vmov 0  }
  0x2f   : > { %298 = vst.msk [vmem:[#allocation2] sm:$0xff] %vm297_vm1, %v848_v4  ;;  %660 = vset.pattern.permute.xlu0 %v849_v7  ;;  %661 = vset.pattern.permute.xlu1 %v849_v7  ;;  %s259_s18 = scalar_lea.vmem [#allocation10], %s974_s1  ;;  %s582_s24 = sshll.u32 %s837_s15, 3 }
  0x30   : > { %299 = vst.msk [vmem:[#allocation3] sm:$0xff] %vm297_vm1, %v847_v0  ;;  %662 = vset.pattern.permute.xlu2 %v849_v7  ;;  %v304_v12 = vld [vmem:[%s259_s18] sm:$0xff]  ;;  %s430_s19 = scalar_lea.hbm %s1043_s3, %s582_s24  ;;  %s292_s21 = scalar_lea.vmem [#allocation11], %s974_s1 }
  0x31   : > { %579 = vmatmul.msk.f32.vlgmr.msra.gmra.mxu0 %vm300_vm0, %v305_v3  ;;  %376 = vmatpush.msra.mxu1 %v304_v12  ;;  %s432_s23 = sshll.u32 %s292_s21, 4  ;;  %s434_s6 = sshll.u32 %s430_s19, 4  ;;  %s433_s23 = int_to_ptr.vmem [resolvable:$true] %s432_s23  ;;  %s435_s6 = int_to_ptr.hbm [resolvable:$true] %s434_s6 }
  0x32   : > { %s419_s7 = scalar_lea.sflag [#allocation7], %s971_s22  ;;  %s773_s8 = sshra.s32 %s435_s6, 4  ;;  %s774_s8 = int_to_ptr.hbm [resolvable:$true] %s773_s8 }
  0x33   : > { %s775_s10 = scalar_lea.hbm %s774_s8, 8  ;;  %s779_s9 = scalar_lea.hbm %s1043_s3, 16 }
  0x34   : > { %p776_p4 = scmp.ne.s32.totalorder %s774_s8, %s775_s10  ;;  %p780_p7 = scmp.lt.s32.totalorder %s774_s8, %s1043_s3 }
  0x35   : > { %v381_v28 = vld [vmem:[#allocation4] sm:$0xff]  ;;  %p781_p8 = scmp.lt.s32.totalorder %s779_s9, %s775_s10 }
  0x36   : > { %v333_v8 = vld [vmem:[#allocation2] sm:$0xff]  ;;  %p777_p5 = pnand %p776_p4, %p925_p9 }
  0x37   : > { %v350_v20 = vld [vmem:[#allocation3] sm:$0xff]  ;;  %p782_p10 = por %p781_p8, %p780_p7 }
  0x38   : > { %p778_p6 = pneg %p777_p5 }
  0x3a   : > { %p783_p13 = pnand %p782_p10, %p778_p6 }
  0xae   : > { %v330_v5 = vpop.f32.mrf.mxu0 }
  0xaf   : > { %v335_v6 = vsel %vm334_vm2, %v330_v5, -inf }
  0xb0   : > { %336 = vmax.xlane.f32.xlu0 %v335_v6 }
 0x123   : > { %v337_v9 = vpop.xlane.xlu0 %336 }
 0x124   : > { %v338_v10 = vmax.f32 %v333_v8, %v337_v9 }
 0x126   : > { %v339_v11 = vsub.f32 %v333_v8, %v338_v10  ;;  %390 = vst.msk [vmem:[#allocation2] sm:$0xff] %vm297_vm1, %v338_v10  ;;  %344 = vperm.xlu0 %660, %v338_v10  }
 0x128   : > { %v340_v18 = vmul.f32 1.442695, %v339_v11 }
 0x198   : > { %v345_v13 = vpop.permute.xlu0 %344 }
 0x199   : > { %v347_v14 = vsub.f32 %v330_v5, %v345_v13 }
 0x19b   : > { %v348_v15 = vmul.f32 1.442695, %v347_v14 }
 0x19d   : > { %663 = vpow2.f32 %v348_v15 }
 0x19e   : > { %665 = vpow2.f32 %v340_v18 }
 0x1a3   : > { %v664_v16 = vpop.eup %663 }
 0x1a4   : > { %580 = vmatmul.msk.f32.vlgmr.msra.gmra.mxu1 %vm334_vm2, %v664_v16  ;;  %v352_v17 = vsel %vm334_vm2, %v664_v16, 0.0  ;;  %v666_v19 = vpop.eup %665 }
 0x1a5   : > { %353 = vadd.xlane.f32.xlu1 %v352_v17  ;;  %v351_v21 = vmul.f32 %v666_v19, %v350_v20 }
 0x1be   : > { %384 = vperm.xlu1 %661, %v666_v19  }
 0x218   : > { %v354_v22 = vpop.xlane.xlu1 %353 }
 0x219   : > { %v355_v23 = vadd.f32 %v354_v22, %v351_v21 }
 0x21b   : > { %357 = vst.msk [vmem:[#allocation3] sm:$0xff] %vm297_vm1, %v355_v23 }
 0x221   : > { %v378_v35 = vpop.f32.mrf.mxu1 }
 0x222   : > { %v394_v24 = vld [vmem:[#allocation3] sm:$0xff] }
 0x223   : > { %v395_v25 = vmax.f32 %v394_v24, 1e-30 }
 0x225   : > { %667 = vrcp.f32 %v395_v25  ;;  %v407_v30 = vand.u32 2147483648, %v395_v25  ;;  %v405_v33 = vand.u32 2147483647, %v395_v25  ;;  %vm401_vm4 = vweird.f32 %v395_v25 }
 0x227   : > { %v408_v38 = vor.u32 1.1754944e-38, %v407_v30  ;;  %vm406_vm6 = vcmp.eq.f32.partialorder %v405_v33, 8.507059e+37 }
 0x22b   : > { %v668_v26 = vpop.eup %667 }
 0x22c   : > { %v397_v27 = vmul.f32 %v668_v26, %v395_v25  ;;  %vm402_vm3 = vweird.f32 %v668_v26 }
 0x22d   : > { %vm403_vm5 = vmor %vm401_vm4, %vm402_vm3 }
 0x22e   : > { %v398_v29 = vsub.f32 1.0, %v397_v27 }
 0x230   : > { %v385_v31 = vpop.permute.xlu1 %384  ;;  %v399_v32 = vmul.f32 %v668_v26, %v398_v29 }
 0x231   : > { %v387_v34 = vmul.f32 %v385_v31, %v381_v28 }
 0x232   : > { %v400_v36 = vadd.f32 %v668_v26, %v399_v32 }
 0x233   : > { %v388_v37 = vadd.f32 %v387_v34, %v378_v35 }
 0x234   : > { %v404_v39 = vsel %vm403_vm5, %v668_v26, %v400_v36 }
 0x235   : > { %389 = vst.msk [vmem:[#allocation4] sm:$0xff] %vm300_vm0, %v388_v37  ;;  %v409_v40 = vsel %vm406_vm6, %v408_v38, %v404_v39 }
 0x236   : > { %413 = vperm.xlu2 %662, %v409_v40  }
 0x23c   : > { %v410_v41 = vld [vmem:[#allocation4] sm:$0xff] }
 0x290   : > { %v414_v42 = vpop.permute.xlu2 %413 }
 0x291   : > { %v416_v43 = vmul.f32 %v414_v42, %v410_v41 }
 0x293   : > { %417 = vst.msk [vmem:[%s292_s21] sm:$0xff] %vm300_vm0, %v416_v43 }
 0x294   : > { %786 = shalt.err (!%p783_p13)
}
 0x295   : > { %591 = dma.vmem_to_hbm [thread:$0]  (%p925_p9), %s433_s23, 128, %s435_s6, %s419_s7  }
 0x296 PF: > { %s446_s22 = sand.u32 1, %s825_s12   ;;  %p604_p0 = pnand %p566_p12, %p932_p11 }
 0x297   : > { %s447_s28 = scalar_lea.sflag [#allocation7], %s446_s22 }
 0x298   : > { %p605_p1 = pneg %p604_p0 }
 0x29a   : > { %820 = dma.done.wait (%p605_p1), %s447_s28, 128  }
 0x29b   : > { %822 = vsyncadd (%p605_p1), %s447_s28, 4294967168  ;;  %s22_s17 = sadd.s32 1, %s845_s17   ;;  %s1057_s30 = sld [smem:[#allocation17_spill]] }
 0x29c   : > { %p19_p2 = scmp.ge.s32.totalorder %s22_s17, 4   ;;  %s1058_s15 = sld [smem:[#allocation15_spill]] }
 0x29d   : > { %s1059_s16 = sld [smem:[#allocation16_spill]]  ;;  %s1060_s12 = smov %s829_s13 }
 0x29e   : > { %s1061_s13 = smov %s833_s14  ;;  %21 = sbr.rel (!%p19_p2) target bundleno = 10 (0xa), region = 109 }
 0x2a1   : > { %s1062_s14 = smov %s1057_s30 }
 0x2a3   :  { %453 = vsyncpa [#allocation6], 1 }
 0x2a4   :  { %455 = vsyncpa [#allocation6 + $0x1], 1 }
 0x2a5   :  { %456 = vsyncpa [#allocation9], 1 }
 0x2a6   :  { %458 = vsyncpa [#allocation9 + $0x1], 1 }
 0x2a7   :  { %459 = vsyncpa [#allocation7], 1 }
 0x2a8   :  { %461 = vsyncpa [#allocation7 + $0x1], 1 }

</bundles_post_ra>
